<compile_context>
chip_gen: v6e
topology: v6e:2x2x1
jax: 0.10.0
libtpu: 0.0.40
codegen_flags: <defaults>
</compile_context>

<pallas_src>
import functools
import math

import jax
import jax.numpy as jnp
from jax.experimental import pallas as pl
from jax.experimental.pallas import tpu as pltpu


def _ffn_kernel(x_ref, w1_ref, b1_ref, w2_ref, b2_ref, o_ref, xn_ref, acc_ref, *,
                approximate_gelu):
    c = pl.program_id(1)
    num_chunks = pl.num_programs(1)

    @pl.when(c == 0)
    def _():
        # Fused LayerNorm statistics: single pass (sum and sum of squares), biased
        # variance (PyTorch LayerNorm), eps = 1e-5.  gamma/beta are folded into W1/b1
        # by the wrapper.  Computed once per row tile and cached for all H chunks.
        x = x_ref[...].astype(jnp.float32)                      # (TM, E)
        inv_e = 1.0 / x.shape[-1]
        s1 = jnp.sum(x, axis=-1, keepdims=True)
        s2 = jnp.sum(x * x, axis=-1, keepdims=True)
        mean = s1 * inv_e
        var = jnp.maximum(s2 * inv_e - mean * mean, 0.0)
        xn = (x - mean) * jax.lax.rsqrt(var + 1e-5)
        xn_ref[...] = xn.astype(xn_ref.dtype)
        acc_ref[...] = jnp.zeros_like(acc_ref)

    # ---- Hidden-dim chunk c:  h_c = GELU(xn @ W1[:, c] + b1[c]);  acc += h_c @ W2[c, :]
    h = jnp.dot(xn_ref[...], w1_ref[...],
                preferred_element_type=jnp.float32) + b1_ref[...]          # (TM, hc) f32
    if approximate_gelu:
        h = jax.nn.gelu(h, approximate=True)          # tanh form -> EUP slot (default)
    else:
        h = 0.5 * h * (1.0 + jax.lax.erf(h * (1.0 / math.sqrt(2.0))))      # exact nn.GELU()
    acc_ref[...] += jnp.dot(h.astype(w2_ref.dtype), w2_ref[...],
                            preferred_element_type=jnp.float32)            # (TM, E) f32

    @pl.when(c == num_chunks - 1)
    def _():
        o_ref[...] = (acc_ref[...] + b2_ref[...]).astype(o_ref.dtype)


def _pick_hidden_chunk(H, target):
    """Largest multiple of 128 that divides H and is <= target (else H itself)."""
    target = min(target, H)
    c = (target // 128) * 128
    while c >= 128:
        if H % c == 0:
            return c
        c -= 128
    return H


def _vmem_need_bytes(tile, E, hc, x_itemsize, mm_itemsize):
    db = 2                                            # double-buffered pipeline inputs/outputs
    need = db * tile * E * x_itemsize                 # x row tile
    need += db * E * hc * mm_itemsize                 # W1' chunk (streamed)
    need += db * hc * 4                               # b1' chunk (f32)
    need += db * hc * E * mm_itemsize                 # W2 chunk (streamed)
    need += db * E * 4                                # b2
    need += db * tile * E * x_itemsize                # output row tile
    need += tile * E * mm_itemsize                    # xn scratch
    need += tile * E * 4                              # f32 accumulator scratch
    need += tile * hc * (4 + mm_itemsize)             # h intermediate (+ narrow copy)
    return need


@functools.partial(
    jax.jit,
    static_argnames=("row_tile", "hidden_chunk", "matmul_dtype", "approximate_gelu"))
def feed_forward_network(x, gamma, beta, w1, b1, w2, b2, *,
                         row_tile=256, hidden_chunk=512,
                         matmul_dtype=jnp.bfloat16, approximate_gelu=True):
    """x: (B, N, E).  Weights stored as (in, out) so the kernel computes x @ W."""
    B, N, E = x.shape
    H = w1.shape[1]
    M = B * N
    xm = x.reshape(M, E)            # no pad copy; partial last row block is masked

    # Fold the LayerNorm affine into the first linear layer:
    #   (xhat*gamma + beta) @ W1 + b1  ==  xhat @ (gamma[:,None]*W1) + (beta @ W1 + b1)
    w1_eff = (w1 * gamma[:, None]).astype(matmul_dtype)
    w2_eff = w2.astype(matmul_dtype)
    b1_eff = (beta @ w1 + b1).reshape(1, H).astype(jnp.float32)
    b2_eff = b2.reshape(1, E).astype(jnp.float32)

    # Row tile: multiple of 16 (safe sublane granularity for f32 and bf16), as large as
    # practical but never far beyond the data; if enough rows exist, ensure >= 2 row
    # steps so the "parallel" axis actually splits across v7x's two TensorCores.
    g = 16
    tile = max(g, g * (row_tile // g))
    tile = min(tile, g * pl.cdiv(M, g))   # may still exceed M; pad rows are masked rows
    if M > g and pl.cdiv(M, tile) < 2:
        tile = max(g, g * pl.cdiv(pl.cdiv(M, 2), g))

    hc = _pick_hidden_chunk(H, hidden_chunk)
    grid = (pl.cdiv(M, tile), H // hc)

    # Scoped-VMEM limit: actual footprint + headroom, capped safely below v7x's 64 MiB.
    need = _vmem_need_bytes(tile, E, hc,
                            jnp.dtype(x.dtype).itemsize, jnp.dtype(matmul_dtype).itemsize)
    vmem_limit = int(min(56 * 2**20, max(32 * 2**20, need + 16 * 2**20)))

    out = pl.pallas_call(
        functools.partial(_ffn_kernel, approximate_gelu=approximate_gelu),
        out_shape=jax.ShapeDtypeStruct((M, E), x.dtype),
        grid_spec=pltpu.PrefetchScalarGridSpec(
            num_scalar_prefetch=0,
            grid=grid,
            in_specs=[
                pl.BlockSpec((tile, E), lambda i, c: (i, 0)),   # x tile (const over c)
                pl.BlockSpec((E, hc), lambda i, c: (0, c)),     # W1' hidden chunk
                pl.BlockSpec((1, hc), lambda i, c: (0, c)),     # b1' hidden chunk
                pl.BlockSpec((hc, E), lambda i, c: (c, 0)),     # W2 hidden chunk
                pl.BlockSpec((1, E), lambda i, c: (0, 0)),      # b2 (tiny, constant)
            ],
            out_specs=pl.BlockSpec((tile, E), lambda i, c: (i, 0)),
            scratch_shapes=[
                pltpu.VMEM((tile, E), matmul_dtype),            # cached normalized x
                pltpu.VMEM((tile, E), jnp.float32),             # output accumulator
            ],
        ),
        compiler_params=pltpu.CompilerParams(
            dimension_semantics=("parallel", "arbitrary"),      # rows parallel, H reduce
            vmem_limit_bytes=vmem_limit,
        ),
    )(xm, w1_eff, b1_eff, w2_eff, b2_eff)

    return out.reshape(B, N, E)


def _init_params(key, embedding_dim, hidden_dim):
    """Deterministic init matching the shapes of the PyTorch module."""
    k1, k2, k3, k4, k5, k6 = jax.random.split(key, 6)
    # Non-trivial LN affine so the folded gamma/beta path is actually exercised.
    gamma = 1.0 + 0.1 * jax.random.normal(k5, (embedding_dim,), jnp.float32)
    beta = 0.1 * jax.random.normal(k6, (embedding_dim,), jnp.float32)
    lim1 = 1.0 / math.sqrt(embedding_dim)
    w1 = jax.random.uniform(k1, (embedding_dim, hidden_dim), jnp.float32, -lim1, lim1)
    b1 = jax.random.uniform(k2, (hidden_dim,), jnp.float32, -lim1, lim1)
    lim2 = 1.0 / math.sqrt(hidden_dim)
    w2 = jax.random.uniform(k3, (hidden_dim, embedding_dim), jnp.float32, -lim2, lim2)
    b2 = jax.random.uniform(k4, (embedding_dim,), jnp.float32, -lim2, lim2)
    return gamma, beta, w1, b1, w2, b2


def _reference(x, gamma, beta, w1, b1, w2, b2):
    """PyTorch-faithful FFN in plain JAX (highest-precision matmuls as the baseline)."""
    mean = jnp.mean(x, axis=-1, keepdims=True)
    var = jnp.mean((x - mean) ** 2, axis=-1, keepdims=True)
    xn = (x - mean) / jnp.sqrt(var + 1e-5) * gamma + beta
    h = jnp.dot(xn, w1, precision=jax.lax.Precision.HIGHEST) + b1
    h = 0.5 * h * (1.0 + jax.lax.erf(h / jnp.sqrt(2.0)))
    return jnp.dot(h, w2, precision=jax.lax.Precision.HIGHEST) + b2


if __name__ == "__main__":
    # ViT-shaped small test: 16x16 image, 4x4 patches -> 16 patches + cls = 17 tokens.
    # E and H are multiples of 128 so the last dims are lane-dense (no masked stores).
    B, N, E, H = 2, 17, 128, 256
    key = jax.random.PRNGKey(0)
    kx, kp = jax.random.split(key)
    x = jax.random.normal(kx, (B, N, E), jnp.float32)
    params = _init_params(kp, E, H)
    ref = _reference(x, *params)

    # 1) Performance defaults: bf16 MXU operands (f32 accumulation) + tanh-GELU.
    out_fast = jax.block_until_ready(feed_forward_network(x, *params))
    assert out_fast.shape == (B, N, E)
    assert jnp.allclose(out_fast, ref, atol=8e-2, rtol=8e-2), "default (bf16) mismatch"

    # 2) Accuracy mode: f32 operands + exact erf-GELU (module-faithful semantics).
    out_exact = jax.block_until_ready(
        feed_forward_network(x, *params, matmul_dtype=jnp.float32,
                             approximate_gelu=False))
    assert jnp.allclose(out_exact, ref, atol=2e-2, rtol=2e-2), "f32/exact path mismatch"

    # 3) Multi row-step grid with a partial (masked) last block + multi H-chunk
    #    accumulation path (the no-pad, chunked-weight path).
    out_tiled = jax.block_until_ready(
        feed_forward_network(x, *params, row_tile=8, hidden_chunk=128))
    assert jnp.allclose(out_tiled, ref, atol=8e-2, rtol=8e-2), "tiled/chunked mismatch"

    print("KERNEL_OK")
</pallas_src>

<mosaic_0001>
module attributes {stable_mosaic.version = 11 : i64} {
  func.func @_ffn_kernel(%arg0: i32, %arg1: i32, %arg2: memref<32x128xf32, #tpu.memory_space<vmem>>, %arg3: memref<128x256xbf16, #tpu.memory_space<vmem>>, %arg4: memref<1x256xf32, #tpu.memory_space<vmem>>, %arg5: memref<256x128xbf16, #tpu.memory_space<vmem>>, %arg6: memref<1x128xf32, #tpu.memory_space<vmem>>, %arg7: memref<32x128xf32, #tpu.memory_space<vmem>>, %arg8: memref<32x128xbf16, #tpu.memory_space<vmem>>, %arg9: memref<32x128xf32, #tpu.memory_space<vmem>>) attributes {dimension_semantics = [#tpu.dimension_semantics<parallel>, #tpu.dimension_semantics<arbitrary>], iteration_bounds = array<i64: 2, 1>, scalar_prefetch = 0 : i64, scratch_operands = 2 : i64, tpu.core_type = #tpu.core_type<tc>, window_params = [{transform_indices = @transform_0, window_bounds = array<i64: 32, 128>}, {transform_indices = @transform_1, window_bounds = array<i64: 128, 256>}, {transform_indices = @transform_2, window_bounds = array<i64: 1, 256>}, {transform_indices = @transform_3, window_bounds = array<i64: 256, 128>}, {pipeline_mode = #tpu.pipeline_mode<synchronous>, transform_indices = @transform_4, window_bounds = array<i64: 1, 128>}, {transform_indices = @transform_5, window_bounds = array<i64: 32, 128>}]} {
    %c0_i32 = arith.constant 0 : i32
    %0 = arith.cmpi eq, %arg1, %c0_i32 : i32
    %1 = arith.extui %0 : i1 to i32
    %c0_i32_0 = arith.constant 0 : i32
    %2 = arith.cmpi ne, %1, %c0_i32_0 : i32
    scf.if %2 {
      %c0_19 = arith.constant 0 : index
      %c0_20 = arith.constant 0 : index
      %31 = vector.load %arg2[%c0_19, %c0_20] : memref<32x128xf32, #tpu.memory_space<vmem>>, vector<32x128xf32>
      %cst_21 = arith.constant dense<0.000000e+00> : vector<32xf32>
      %32 = vector.multi_reduction <add>, %31, %cst_21 [1] : vector<32x128xf32> to vector<32xf32>
      %33 = vector.shape_cast %32 : vector<32xf32> to vector<32x1xf32>
      %34 = arith.mulf %31, %31 : vector<32x128xf32>
      %cst_22 = arith.constant dense<0.000000e+00> : vector<32xf32>
      %35 = vector.multi_reduction <add>, %34, %cst_22 [1] : vector<32x128xf32> to vector<32xf32>
      %36 = vector.shape_cast %35 : vector<32xf32> to vector<32x1xf32>
      %cst_23 = arith.constant 7.812500e-03 : f32
      %37 = vector.broadcast %cst_23 : f32 to vector<32x1xf32>
      %38 = arith.mulf %33, %37 : vector<32x1xf32>
      %cst_24 = arith.constant 7.812500e-03 : f32
      %39 = vector.broadcast %cst_24 : f32 to vector<32x1xf32>
      %40 = arith.mulf %36, %39 : vector<32x1xf32>
      %41 = arith.mulf %38, %38 : vector<32x1xf32>
      %42 = arith.subf %40, %41 : vector<32x1xf32>
      %cst_25 = arith.constant 0.000000e+00 : f32
      %43 = vector.broadcast %cst_25 : f32 to vector<32x1xf32>
      %44 = arith.maximumf %42, %43 : vector<32x1xf32>
      %45 = vector.broadcast %38 : vector<32x1xf32> to vector<32x128xf32>
      %46 = arith.subf %31, %45 : vector<32x128xf32>
      %cst_26 = arith.constant 9.99999974E-6 : f32
      %47 = vector.broadcast %cst_26 : f32 to vector<32x1xf32>
      %48 = arith.addf %44, %47 : vector<32x1xf32>
      %49 = math.rsqrt %48 : vector<32x1xf32>
      %50 = vector.broadcast %49 : vector<32x1xf32> to vector<32x128xf32>
      %51 = arith.mulf %46, %50 : vector<32x128xf32>
      %52 = arith.truncf %51 : vector<32x128xf32> to vector<32x128xbf16>
      %c0_27 = arith.constant 0 : index
      %c0_28 = arith.constant 0 : index
      %53 = vector.load %arg8[%c0_27, %c0_28] : memref<32x128xbf16, #tpu.memory_space<vmem>>, vector<32x128xbf16>
      tpu.vector_store %arg8[%c0_27, %c0_28], %52 {strides = array<i32>} : memref<32x128xbf16, #tpu.memory_space<vmem>>, vector<32x128xbf16>,
      %cst_29 = arith.constant 0.000000e+00 : f32
      %54 = vector.broadcast %cst_29 : f32 to vector<32x128xf32>
      %c0_30 = arith.constant 0 : index
      %c0_31 = arith.constant 0 : index
      %55 = vector.load %arg9[%c0_30, %c0_31] : memref<32x128xf32, #tpu.memory_space<vmem>>, vector<32x128xf32>
      tpu.vector_store %arg9[%c0_30, %c0_31], %54 {strides = array<i32>} : memref<32x128xf32, #tpu.memory_space<vmem>>, vector<32x128xf32>,
    } else {
    }
    %c0 = arith.constant 0 : index
    %c0_1 = arith.constant 0 : index
    %3 = vector.load %arg8[%c0, %c0_1] : memref<32x128xbf16, #tpu.memory_space<vmem>>, vector<32x128xbf16>
    %c0_2 = arith.constant 0 : index
    %c0_3 = arith.constant 0 : index
    %4 = vector.load %arg3[%c0_2, %c0_3] : memref<128x256xbf16, #tpu.memory_space<vmem>>, vector<128x256xbf16>
    %cst = arith.constant dense<0.000000e+00> : vector<32x256xf32>
    %5 = tpu.matmul %3, %4, %cst {dimension_numbers = #tpu.dot_dimension_numbers<[1], [0], [0], [1], [0, 0, 1, 1], [], []>} : vector<32x128xbf16>, vector<128x256xbf16>, vector<32x256xf32> -> vector<32x256xf32>
    %c0_4 = arith.constant 0 : index
    %c0_5 = arith.constant 0 : index
    %6 = vector.load %arg4[%c0_4, %c0_5] : memref<1x256xf32, #tpu.memory_space<vmem>>, vector<1x256xf32>
    %7 = vector.broadcast %6 : vector<1x256xf32> to vector<32x256xf32>
    %8 = arith.addf %5, %7 : vector<32x256xf32>
    %9 = arith.mulf %8, %8 : vector<32x256xf32>
    %10 = arith.mulf %8, %9 : vector<32x256xf32>
    %cst_6 = arith.constant 4.471500e-02 : f32
    %11 = vector.broadcast %cst_6 : f32 to vector<32x256xf32>
    %12 = arith.mulf %11, %10 : vector<32x256xf32>
    %13 = arith.addf %8, %12 : vector<32x256xf32>
    %cst_7 = arith.constant 0.797884583 : f32
    %14 = vector.broadcast %cst_7 : f32 to vector<32x256xf32>
    %15 = arith.mulf %14, %13 : vector<32x256xf32>
    %16 = math.tanh %15 : vector<32x256xf32>
    %cst_8 = arith.constant 1.000000e+00 : f32
    %17 = vector.broadcast %cst_8 : f32 to vector<32x256xf32>
    %18 = arith.addf %17, %16 : vector<32x256xf32>
    %cst_9 = arith.constant 5.000000e-01 : f32
    %19 = vector.broadcast %cst_9 : f32 to vector<32x256xf32>
    %20 = arith.mulf %19, %18 : vector<32x256xf32>
    %21 = arith.mulf %8, %20 : vector<32x256xf32>
    %c0_10 = arith.constant 0 : index
    %c0_11 = arith.constant 0 : index
    %22 = vector.load %arg9[%c0_10, %c0_11] : memref<32x128xf32, #tpu.memory_space<vmem>>, vector<32x128xf32>
    %23 = arith.truncf %21 : vector<32x256xf32> to vector<32x256xbf16>
    %c0_12 = arith.constant 0 : index
    %c0_13 = arith.constant 0 : index
    %24 = vector.load %arg5[%c0_12, %c0_13] : memref<256x128xbf16, #tpu.memory_space<vmem>>, vector<256x128xbf16>
    %cst_14 = arith.constant dense<0.000000e+00> : vector<32x128xf32>
    %25 = tpu.matmul %23, %24, %cst_14 {dimension_numbers = #tpu.dot_dimension_numbers<[1], [0], [0], [1], [0, 0, 1, 1], [], []>} : vector<32x256xbf16>, vector<256x128xbf16>, vector<32x128xf32> -> vector<32x128xf32>
    %26 = arith.addf %22, %25 : vector<32x128xf32>
    %c0_15 = arith.constant 0 : index
    %c0_16 = arith.constant 0 : index
    %27 = vector.load %arg9[%c0_15, %c0_16] : memref<32x128xf32, #tpu.memory_space<vmem>>, vector<32x128xf32>
    tpu.vector_store %arg9[%c0_15, %c0_16], %26 {strides = array<i32>} : memref<32x128xf32, #tpu.memory_space<vmem>>, vector<32x128xf32>,
    %c0_i32_17 = arith.constant 0 : i32
    %28 = arith.cmpi eq, %arg1, %c0_i32_17 : i32
    %29 = arith.extui %28 : i1 to i32
    %c0_i32_18 = arith.constant 0 : i32
    %30 = arith.cmpi ne, %29, %c0_i32_18 : i32
    scf.if %30 {
      %c0_19 = arith.constant 0 : index
      %c0_20 = arith.constant 0 : index
      %31 = vector.load %arg9[%c0_19, %c0_20] : memref<32x128xf32, #tpu.memory_space<vmem>>, vector<32x128xf32>
      %c0_21 = arith.constant 0 : index
      %c0_22 = arith.constant 0 : index
      %32 = vector.load %arg6[%c0_21, %c0_22] : memref<1x128xf32, #tpu.memory_space<vmem>>, vector<1x128xf32>
      %33 = vector.broadcast %32 : vector<1x128xf32> to vector<32x128xf32>
      %34 = arith.addf %31, %33 : vector<32x128xf32>
      %c0_23 = arith.constant 0 : index
      %c0_24 = arith.constant 0 : index
      %35 = vector.load %arg7[%c0_23, %c0_24] : memref<32x128xf32, #tpu.memory_space<vmem>>, vector<32x128xf32>
      tpu.vector_store %arg7[%c0_23, %c0_24], %34 {strides = array<i32>} : memref<32x128xf32, #tpu.memory_space<vmem>>, vector<32x128xf32>,
    } else {
    }
    return
  }
  func.func @transform_0(%arg0: i32, %arg1: i32) -> (i32, i32) {
    %c0_i32 = arith.constant 0 : i32
    %c0_i32_0 = arith.constant 0 : i32
    return %arg0, %c0_i32 : i32, i32
  }
  func.func @transform_1(%arg0: i32, %arg1: i32) -> (i32, i32) {
    %c0_i32 = arith.constant 0 : i32
    %c0_i32_0 = arith.constant 0 : i32
    return %c0_i32, %arg1 : i32, i32
  }
  func.func @transform_2(%arg0: i32, %arg1: i32) -> (i32, i32) {
    %c0_i32 = arith.constant 0 : i32
    %c0_i32_0 = arith.constant 0 : i32
    return %c0_i32, %arg1 : i32, i32
  }
  func.func @transform_3(%arg0: i32, %arg1: i32) -> (i32, i32) {
    %c0_i32 = arith.constant 0 : i32
    %c0_i32_0 = arith.constant 0 : i32
    return %arg1, %c0_i32 : i32, i32
  }
  func.func @transform_4(%arg0: i32, %arg1: i32) -> (i32, i32) {
    %c0_i32 = arith.constant 0 : i32
    %c0_i32_0 = arith.constant 0 : i32
    %c0_i32_1 = arith.constant 0 : i32
    return %c0_i32, %c0_i32_0 : i32, i32
  }
  func.func @transform_5(%arg0: i32, %arg1: i32) -> (i32, i32) {
    %c0_i32 = arith.constant 0 : i32
    %c0_i32_0 = arith.constant 0 : i32
    return %arg0, %c0_i32 : i32, i32
  }
}

</mosaic_0001>

<bundles_post_ra>
// kernel: feed_forward_network.1
= control target key start
LH: loop header
LB: loop body
LE: loop exit
PB: predicated region body
PF: predicated region fallthrough
CT: control target
= control target key end

     0   :  { %s1571_s18 = smov 0   ;;  %s1573_s19 = smov 0   ;;  %s1865_s0 = inlined_call_operand.vmem [shape: f32[34,128], index: 0, kind: input, shape index: {}]   ;;  %s1866_s1 = inlined_call_operand.vmem [shape: bf16[128,256], index: 1, kind: input, shape index: {}]   ;;  %s1867_s2 = inlined_call_operand.vmem [shape: f32[1,256], index: 2, kind: input, shape index: {}]   ;;  %s1868_s3 = inlined_call_operand.vmem [shape: bf16[256,128], index: 3, kind: input, shape index: {}]   ;;  %s1869_s4 = inlined_call_operand.vmem [shape: f32[1,128], index: 4, kind: input, shape index: {}]   ;;  %s1870_s5 = inlined_call_operand.vmem [shape: f32[34,128], index: 5, kind: output, shape index: {}]  }
   0x1   :  { %s1575_s20 = smov 0   ;;  %s1577_s21 = smov 0  }
   0x2   :  { %s1579_s22 = smov 0  }
   0x3 LB: > { %s1152_s23 = sadd.s32 4294967295, %s1506_s22   ;;  %s27_s24 = sadd.s32 1, %s1502_s21  ;;  %s1506_s22 = sphi %s1579_s22, %s15_s22   ;;  %s1502_s21 = sphi %s1577_s21, %s1878_s21   ;;  %s1498_s20 = sphi %s1575_s20, %s1877_s20   ;;  %s1494_s19 = sphi %s1573_s19, %s1876_s19   ;;  %s1490_s18 = sphi %s1571_s18, %s1875_s18  }
   0x4   : > { %p29_p0 = scmp.ge.s32.totalorder %s27_s24, 2  ;;  %s159_s25 = sadd.s32 1, %s1494_s19 }
   0x5   : > { %p169_p1 = scmp.ne.s32.totalorder %s1494_s19, %s1490_s18  ;;  %p170_p2 = scmp.eq.s32.totalorder %s1152_s23, 1 }
   0x6   : > { %s1880_s24 = smov (%p29_p0, %s27_s24), 0  ;;  %p1159_p4 = scmp.ge.s32.totalorder %s1506_s22, 1 }
   0x7   : > { %p1603_p3 = por %p170_p2, %p169_p1  ;;  %s156_s27 = ssub.s32 %s1502_s21, %s1880_s24 }
   0x8   : > { %p240_p5 = scmp.lt.s32.totalorder %s1506_s22, 3  ;;  %p157_p6 = scmp.eq.s32.totalorder %s156_s27, 0 }
   0xa   : > { %p241_p7 = pnand %p1159_p4, %p240_p5 }
   0xb   : > { %s1612_s28 = scalar_select %p157_p6, %s1494_s19, %s159_s25  }
   0xc   : > { %244 = sbr.rel (%p241_p7) target bundleno = 685 (0x2ad), region = 40  ;;  %s1615_s29 = sshll.u32 (!%p241_p7), %s1498_s20, 2 }
   0xd   : > { %p290_p8 = scmp.lt.s32.totalorder (!%p241_p7), %s1615_s29, 4  ;;  %s282_s12 = sand.u32 (!%p241_p7), 1, %s1490_s18  }
   0xe   : > { %s1160_s13 = sshll.u32 (!%p241_p7), %s282_s12, 5 }
   0xf   : > { %s1798_s16 = scalar_lea.vmem (!%p241_p7), [#allocation4], %s1160_s13  }
  0x11   : > { %s291_s30 = scalar_select %p290_p8, %s1615_s29, 4  ;;  %v1370_v8 = vld [vmem:[%s1866_s1 + $0x74] ss:$8 sps:$4 sm:$0xff]   ;;  %v1372_v9 = vld [vmem:[%s1866_s1 + $0x70] ss:$8 sps:$4 sm:$0xff]   ;;  %v1540_v24 = vmov 0  }
  0x12   : > { %534 = vmatprep.subr.bf16.mxu0 %v1370_v8  ;;  %v1373_v10 = vld [vmem:[%s1866_s1 + $0x64] ss:$8 sps:$4 sm:$0xff]   ;;  %v1375_v11 = vld [vmem:[%s1866_s1 + $0x60] ss:$8 sps:$4 sm:$0xff]   ;;  %v1376_v12 = vld [vmem:[%s1866_s1 + $0x54] ss:$8 sps:$4 sm:$0xff]   ;;  %566 = vmatprep.mubr.bf16.mxu0 %v1540_v24 }
  0x13   : > { %s1162_s6 = sshll.u32 %s291_s30, 3  ;;  %535 = vmatpush1.bf16.msra.mxu0 %v1372_v9  ;;  %v1378_v13 = vld [vmem:[%s1866_s1 + $0x50] ss:$8 sps:$4 sm:$0xff]   ;;  %v1379_v14 = vld [vmem:[%s1866_s1 + $0x44] ss:$8 sps:$4 sm:$0xff]   ;;  %s882_s18 = ssub.s32 (%p1603_p3), 5, %s1615_s29 }
  0x14   : > { %s293_s9 = scalar_lea.vmem %s1865_s0, %s1162_s6  ;;  %536 = vmatprep.subr.bf16.mxu0 %v1373_v10  ;;  %v1381_v15 = vld [vmem:[%s1866_s1 + $0x40] ss:$8 sps:$4 sm:$0xff]   ;;  %v1382_v16 = vld [vmem:[%s1866_s1 + $0x34] ss:$8 sps:$4 sm:$0xff]   ;;  %v1384_v17 = vld [vmem:[%s1866_s1 + $0x30] ss:$8 sps:$4 sm:$0xff]  }
  0x15   : > { %v1622_v0 = vld [vmem:[%s293_s9] sm:$0xff]  ;;  %v1624_v1 = vld [vmem:[%s293_s9 + $0x8] sm:$0xff]  ;;  %v1631_v4 = vld [vmem:[%s293_s9 + $0x10] sm:$0xff]  ;;  %s1223_s17 = sshll.u32 (%p1603_p3), %s1498_s20, 5  ;;  %p883_p9 = scmp.lt.s32.totalorder (%p1603_p3), %s882_s18, 4 }
  0x16   : > { %330 = vadd.xlane.f32.xlu0 %v1622_v0  ;;  %v338_v2 = vmul.f32 %v1622_v0, %v1622_v0  ;;  %v339_v3 = vmul.f32 %v1624_v1, %v1624_v1  ;;  %v1634_v5 = vld [vmem:[%s293_s9 + $0x18] sm:$0xff]  ;;  %v340_v6 = vmul.f32 %v1631_v4, %v1631_v4  ;;  %v1385_v18 = vld [vmem:[%s1866_s1 + $0x24] ss:$8 sps:$4 sm:$0xff]   ;;  %v1387_v19 = vld [vmem:[%s1866_s1 + $0x20] ss:$8 sps:$4 sm:$0xff]   ;;  %s1811_s27 = scalar_lea.vmem (%p1603_p3), %s1870_s5, %s1223_s17  }
  0x17   : > { %v341_v7 = vmul.f32 %v1634_v5, %v1634_v5  ;;  %537 = vmatpush1.bf16.msra.mxu0 %v1375_v11  ;;  %v1388_v20 = vld [vmem:[%s1866_s1 + $0x14] ss:$8 sps:$4 sm:$0xff]   ;;  %v1390_v21 = vld [vmem:[%s1866_s1 + $0x10] ss:$8 sps:$4 sm:$0xff]   ;;  %v1391_v22 = vld [vmem:[%s1866_s1 + $0x4] ss:$8 sps:$4 sm:$0xff]  }
  0x18   : > { %342 = vadd.xlane.f32.xlu1 %v338_v2  ;;  %538 = vmatprep.subr.bf16.mxu0 %v1376_v12  ;;  %v1393_v23 = vld [vmem:[%s1866_s1] ss:$8 sps:$4 sm:$0xff]   ;;  %v1399_v12 = vld [vmem:[%s1868_s3 + $0x30] sm:$0xff]  }
  0x1a   : > { %332 = vadd.xlane.f32.xlu0 %v1624_v1 }
  0x1b   : > { %539 = vmatpush1.bf16.msra.mxu0 %v1378_v13  ;;  %v1400_v13 = vld [vmem:[%s1868_s3 + $0x68] sm:$0xff]  }
  0x1c   : > { %344 = vadd.xlane.f32.xlu1 %v339_v3  ;;  %540 = vmatprep.subr.bf16.mxu0 %v1379_v14  ;;  %v1401_v14 = vld [vmem:[%s1868_s3 + $0x28] sm:$0xff]  }
  0x1e   : > { %334 = vadd.xlane.f32.xlu0 %v1631_v4 }
  0x1f   : > { %541 = vmatpush1.bf16.msra.mxu0 %v1381_v15  ;;  %v1402_v15 = vld [vmem:[%s1868_s3 + $0x60] sm:$0xff]  }
  0x20   : > { %336 = vadd.xlane.f32.xlu1 %v1634_v5  ;;  %542 = vmatprep.subr.bf16.mxu0 %v1382_v16  ;;  %v1403_v16 = vld [vmem:[%s1868_s3 + $0x20] sm:$0xff]  }
  0x22   : > { %346 = vadd.xlane.f32.xlu0 %v340_v6 }
  0x23   : > { %543 = vmatpush1.bf16.msra.mxu0 %v1384_v17  ;;  %v1404_v17 = vld [vmem:[%s1868_s3 + $0x58] sm:$0xff]  }
  0x24   : > { %348 = vadd.xlane.f32.xlu1 %v341_v7  ;;  %544 = vmatprep.subr.bf16.mxu0 %v1385_v18  ;;  %v1405_v18 = vld [vmem:[%s1868_s3 + $0x18] sm:$0xff]  }
  0x27   : > { %545 = vmatpush1.bf16.msra.mxu0 %v1387_v19  ;;  %v1406_v19 = vld [vmem:[%s1868_s3 + $0x50] sm:$0xff]  }
  0x28   : > { %546 = vmatprep.subr.bf16.mxu0 %v1388_v20  ;;  %v1407_v20 = vld [vmem:[%s1868_s3 + $0x10] sm:$0xff]  }
  0x2b   : > { %547 = vmatpush1.bf16.msra.mxu0 %v1390_v21  ;;  %v1408_v21 = vld [vmem:[%s1868_s3 + $0x48] sm:$0xff]  }
  0x2c   : > { %548 = vmatprep.subr.bf16.mxu0 %v1391_v22  ;;  %v1409_v22 = vld [vmem:[%s1868_s3 + $0x8] sm:$0xff]  }
  0x2f   : > { %549 = vmatpush1.bf16.msra.mxu0 %v1393_v23  ;;  %v1410_v23 = vld [vmem:[%s1868_s3 + $0x40] sm:$0xff]  }
  0x9f   : > { %v331_v25 = vpop.xlane.xlu0 %330 }
  0xa0   : > { %v350_v26 = vmul.f32 0.0078125, %v331_v25  ;;  %v432_v25 = vlaneseq }
  0xa1   : > { %v343_v27 = vpop.xlane.xlu1 %342 }
  0xa2   : > { %v358_v28 = vmul.f32 %v350_v26, %v350_v26  ;;  %v354_v29 = vmul.f32 0.0078125, %v343_v27  ;;  %v370_v58 = vsub.f32 %v1622_v0, %v350_v26  ;;  %v433_v26 = vshrl.u32 %v432_v25, 7 }
  0xa3   : > { %v333_v30 = vpop.xlane.xlu0 %332 }
  0xa4   : > { %v362_v31 = vsub.f32 %v354_v29, %v358_v28  ;;  %v351_v32 = vmul.f32 0.0078125, %v333_v30  ;;  %v434_v27 = vsub.s32 0, %v433_v26  ;;  %v430_v28 = vld [vmem:[%s1867_s2] sm:$0x3]  ;;  %v438_v29 = vsub.s32 1, %v433_v26 }
  0xa5   : > { %v345_v33 = vpop.xlane.xlu1 %344 }
  0xa6   : > { %v366_v34 = vmax.f32 %v362_v31, 0.0  ;;  %v359_v35 = vmul.f32 %v351_v32, %v351_v32  ;;  %v355_v36 = vmul.f32 0.0078125, %v345_v33  ;;  %v371_v59 = vsub.f32 %v1624_v1, %v351_v32  ;;  %v1396_v1 = vld [vmem:[%s1868_s3 + $0x78] sm:$0xff]  }
  0xa7   : > { %v335_v37 = vpop.xlane.xlu0 %334  ;;  %1237 = vmatprep.subr.bf16.mxu1 %v1396_v1  ;;  %v435_v30 = vrot.slane %v430_v28, %v434_v27  ;;  %v439_v31 = vrot.slane %v430_v28, %v438_v29 }
  0xa8   : > { %v374_v38 = vadd.f32 1e-05, %v366_v34  ;;  %v363_v39 = vsub.f32 %v355_v36, %v359_v35  ;;  %v352_v40 = vmul.f32 0.0078125, %v335_v37 }
  0xa9   : > { %v337_v41 = vpop.xlane.xlu1 %336 }
  0xaa   : > { %v367_v42 = vmax.f32 %v363_v39, 0.0  ;;  %v360_v43 = vmul.f32 %v352_v40, %v352_v40  ;;  %v353_v44 = vmul.f32 0.0078125, %v337_v41  ;;  %1412 = vrsqrt.f32 %v374_v38 }
  0xab   : > { %v347_v45 = vpop.xlane.xlu0 %346  ;;  %v372_v3 = vsub.f32 %v1631_v4, %v352_v40  ;;  %v1397_v4 = vld [vmem:[%s1868_s3 + $0x38] sm:$0xff]  }
  0xac   : > { %v375_v46 = vadd.f32 1e-05, %v367_v42  ;;  %v356_v47 = vmul.f32 0.0078125, %v347_v45  ;;  %v361_v49 = vmul.f32 %v353_v44, %v353_v44  ;;  %v373_v6 = vsub.f32 %v1634_v5, %v353_v44  ;;  %1238 = vmatpush3.bf16.msra.mxu1 %v1397_v4  ;;  %v1398_v5 = vld [vmem:[%s1868_s3 + $0x70] sm:$0xff]  }
  0xad   : > { %v349_v48 = vpop.xlane.xlu1 %348  ;;  %1239 = vmatprep.subr.bf16.mxu1 %v1398_v5 }
  0xae   : > { %1414 = vrsqrt.f32 %v375_v46  ;;  %v364_v50 = vsub.f32 %v356_v47, %v360_v43  ;;  %v357_v51 = vmul.f32 0.0078125, %v349_v48 }
  0xb0   : > { %v368_v52 = vmax.f32 %v364_v50, 0.0  ;;  %v365_v53 = vsub.f32 %v357_v51, %v361_v49  ;;  %1240 = vmatpush3.bf16.msra.mxu1 %v1399_v12 }
  0xb1   : > { %1241 = vmatprep.subr.bf16.mxu1 %v1400_v13 }
  0xb2   : > { %v376_v54 = vadd.f32 1e-05, %v368_v52  ;;  %v369_v55 = vmax.f32 %v365_v53, 0.0 }
  0xb4   : > { %1416 = vrsqrt.f32 %v376_v54  ;;  %v377_v56 = vadd.f32 1e-05, %v369_v55  ;;  %1242 = vmatpush3.bf16.msra.mxu1 %v1401_v14 }
  0xb5   : > { %1243 = vmatprep.subr.bf16.mxu1 %v1402_v15 }
  0xb6   : > { %1418 = vrsqrt.f32 %v377_v56 }
  0xb7   : > { %v1413_v57 = vpop.eup %1412 }
  0xb8   : > { %v382_v61 = vmul.f32 %v1413_v57, %v370_v58  ;;  %1244 = vmatpush3.bf16.msra.mxu1 %v1403_v16 }
  0xb9   : > { %1245 = vmatprep.subr.bf16.mxu1 %v1404_v17 }
  0xbb   : > { %v1415_v60 = vpop.eup %1414 }
  0xbc   : > { %v383_v62 = vmul.f32 %v1415_v60, %v371_v59  ;;  %1246 = vmatpush3.bf16.msra.mxu1 %v1405_v18 }
  0xbd   : > { %1247 = vmatprep.subr.bf16.mxu1 %v1406_v19 }
  0xbe   : > { %v1229_v63 = vpack.c.bf16 %v383_v62, %v382_v61 }
  0xc0   : > { %1230 = vst [vmem:[#allocation2] sm:$0xff] %v1229_v63   ;;  %1248 = vmatpush3.bf16.msra.mxu1 %v1407_v20 }
  0xc1   : > { %v1417_v2 = vpop.eup %1416  ;;  %1249 = vmatprep.subr.bf16.mxu1 %v1408_v21 }
  0xc2   : > { %v384_v8 = vmul.f32 %v1417_v2, %v372_v3 }
  0xc3   : > { %v1419_v7 = vpop.eup %1418 }
  0xc4   : > { %v385_v9 = vmul.f32 %v1419_v7, %v373_v6  ;;  %1250 = vmatpush3.bf16.msra.mxu1 %v1409_v22 }
  0xc5   : > { %1251 = vmatprep.subr.bf16.mxu1 %v1410_v23 }
  0xc6   : > { %v1234_v10 = vpack.c.bf16 %v385_v9, %v384_v8 }
  0xc7   : > { %v1394_v11 = vld [vmem:[#allocation2] sm:$0xff]  }
  0xc8   : > { %1236 = vst [vmem:[#allocation2 + $0x8] sm:$0xff] %v1234_v10   ;;  %567 = vmatmul.mubr.bf16.vlgmr.msra.gmra.mxu0 %v1394_v11 }
  0xc9   : > { %576 = vmatprep.mubr.bf16.mxu0 %v1540_v24  ;;  %v1411_v24 = vld [vmem:[%s1868_s3] sm:$0xff]  }
  0xca   : > { %1252 = vmatpush3.bf16.msra.mxu1 %v1411_v24 }
  0xcf   : > { %v1395_v0 = vld [vmem:[#allocation2 + $0x8] sm:$0xff]  }
  0xd0   : > { %577 = vmatmul.mubr.bf16.gmra.mxu0 %v1395_v0 }
 0x188   : > { %v568_v32 = vpop.f32.mrf.mxu0 }
 0x189   : > { %v1745_v33 = vadd.f32 %v568_v32, %v435_v30 }
 0x18a   : > { %v570_v34 = vpop.f32.mrf.mxu0 }
 0x18b   : > { %v587_v35 = vmul.f32 %v1745_v33, %v1745_v33  ;;  %v1749_v36 = vadd.f32 %v570_v34, %v439_v31 }
 0x18c   : > { %v572_v37 = vpop.f32.mrf.mxu0 }
 0x18d   : > { %v595_v38 = vmul.f32 %v587_v35, %v1745_v33  ;;  %v588_v39 = vmul.f32 %v1749_v36, %v1749_v36  ;;  %v1754_v40 = vadd.f32 %v572_v37, %v435_v30 }
 0x18e   : > { %v574_v41 = vpop.f32.mrf.mxu0 }
 0x18f   : > { %v603_v42 = vmul.f32 0.044715, %v595_v38  ;;  %v596_v43 = vmul.f32 %v588_v39, %v1749_v36  ;;  %v589_v44 = vmul.f32 %v1754_v40, %v1754_v40  ;;  %v1759_v45 = vadd.f32 %v574_v41, %v439_v31 }
 0x190   : > { %v578_v46 = vpop.f32.mrf.mxu0 }
 0x191   : > { %v611_v47 = vadd.f32 %v603_v42, %v1745_v33  ;;  %v604_v48 = vmul.f32 0.044715, %v596_v43  ;;  %v597_v49 = vmul.f32 %v589_v44, %v1754_v40  ;;  %v590_v50 = vmul.f32 %v1759_v45, %v1759_v45 }
 0x192   : > { %v1765_v51 = vadd.f32 %v578_v46, %v435_v30  ;;  %v580_v52 = vpop.f32.mrf.mxu0 }
 0x193   : > { %v619_v53 = vmul.f32 0.7978846, %v611_v47  ;;  %v612_v54 = vadd.f32 %v604_v48, %v1749_v36  ;;  %v605_v55 = vmul.f32 0.044715, %v597_v49  ;;  %v598_v56 = vmul.f32 %v590_v50, %v1759_v45 }
 0x194   : > { %v591_v57 = vmul.f32 %v1765_v51, %v1765_v51  ;;  %v1771_v58 = vadd.f32 %v580_v52, %v439_v31  ;;  %v582_v59 = vpop.f32.mrf.mxu0 }
 0x195   : > { %v613_v60 = vadd.f32 %v605_v55, %v1754_v40  ;;  %v606_v61 = vmul.f32 0.044715, %v598_v56  ;;  %v1774_v62 = vadd.f32 %v582_v59, %v435_v30  ;;  %1420 = vtanh.f32 %v619_v53 }
 0x196   : > { %v599_v63 = vmul.f32 %v591_v57, %v1765_v51  ;;  %v592_v2 = vmul.f32 %v1771_v58, %v1771_v58  ;;  %v584_v3 = vpop.f32.mrf.mxu0  ;;  %v620_v6 = vmul.f32 0.7978846, %v612_v54 }
 0x197   : > { %v621_v7 = vmul.f32 0.7978846, %v613_v60  ;;  %v614_v8 = vadd.f32 %v606_v61, %v1759_v45  ;;  %v593_v9 = vmul.f32 %v1774_v62, %v1774_v62  ;;  %v585_v10 = vadd.f32 %v584_v3, %v439_v31  ;;  %v1201_v3 = vld [vmem:[%s1869_s4] ss:$0 sm:$0xff] }
 0x198   : > { %v607_v11 = vmul.f32 0.044715, %v599_v63  ;;  %v600_v0 = vmul.f32 %v592_v2, %v1771_v58  ;;  %1422 = vtanh.f32 %v620_v6 }
 0x199   : > { %1424 = vtanh.f32 %v621_v7  ;;  %v601_v1 = vmul.f32 %v593_v9, %v1774_v62  ;;  %v594_v4 = vmul.f32 %v585_v10, %v585_v10  ;;  %v622_v5 = vmul.f32 0.7978846, %v614_v8 }
 0x19a   : > { %v615_v12 = vadd.f32 %v607_v11, %v1765_v51  ;;  %v608_v13 = vmul.f32 0.044715, %v600_v0 }
 0x19b   : > { %v609_v14 = vmul.f32 0.044715, %v601_v1  ;;  %v602_v15 = vmul.f32 %v594_v4, %v585_v10  ;;  %1426 = vtanh.f32 %v622_v5 }
 0x19c   : > { %v623_v16 = vmul.f32 0.7978846, %v615_v12  ;;  %v616_v17 = vadd.f32 %v608_v13, %v1771_v58 }
 0x19d   : > { %v617_v18 = vadd.f32 %v609_v14, %v1774_v62  ;;  %v610_v19 = vmul.f32 0.044715, %v602_v15 }
 0x19e   : > { %1428 = vtanh.f32 %v623_v16  ;;  %v624_v20 = vmul.f32 0.7978846, %v616_v17 }
 0x19f   : > { %v625_v21 = vmul.f32 0.7978846, %v617_v18  ;;  %v618_v22 = vadd.f32 %v610_v19, %v585_v10 }
 0x1a0   : > { %1430 = vtanh.f32 %v624_v20 }
 0x1a1   : > { %1432 = vtanh.f32 %v625_v21  ;;  %v626_v23 = vmul.f32 0.7978846, %v618_v22 }
 0x1a2   : > { %v1421_v24 = vpop.eup %1420 }
 0x1a3   : > { %1434 = vtanh.f32 %v626_v23  ;;  %v635_v28 = vadd.f32 1.0, %v1421_v24 }
 0x1a5   : > { %v1423_v25 = vpop.eup %1422  ;;  %v643_v35 = vmul.f32 0.5, %v635_v28 }
 0x1a6   : > { %v1425_v26 = vpop.eup %1424  ;;  %v636_v27 = vadd.f32 1.0, %v1423_v25 }
 0x1a7   : > { %v637_v29 = vadd.f32 1.0, %v1425_v26  ;;  %v651_v46 = vmul.f32 %v643_v35, %v1745_v33 }
 0x1a8   : > { %v1427_v30 = vpop.eup %1426  ;;  %v644_v32 = vmul.f32 0.5, %v636_v27 }
 0x1a9   : > { %v638_v31 = vadd.f32 1.0, %v1427_v30  ;;  %v645_v34 = vmul.f32 0.5, %v637_v29 }
 0x1aa   : > { %v652_v42 = vmul.f32 %v644_v32, %v1749_v36 }
 0x1ab   : > { %v1429_v37 = vpop.eup %1428  ;;  %v646_v38 = vmul.f32 0.5, %v638_v31  ;;  %v653_v39 = vmul.f32 %v645_v34, %v1754_v40 }
 0x1ac   : > { %v639_v48 = vadd.f32 1.0, %v1429_v37 }
 0x1ad   : > { %v1431_v41 = vpop.eup %1430  ;;  %v654_v43 = vmul.f32 %v646_v38, %v1759_v45  ;;  %v663_v53 = vpack.c.bf16 %v653_v39, %v651_v46 }
 0x1ae   : > { %v1433_v44 = vpop.eup %1432  ;;  %v640_v47 = vadd.f32 1.0, %v1431_v41  ;;  %v647_v40 = vmul.f32 0.5, %v639_v48 }
 0x1af   : > { %v664_v49 = vpack.c.bf16 %v654_v43, %v652_v42  ;;  %v641_v50 = vadd.f32 1.0, %v1433_v44 }
 0x1b0   : > { %v1435_v52 = vpop.eup %1434  ;;  %v648_v55 = vmul.f32 0.5, %v640_v47  ;;  %v655_v33 = vmul.f32 %v647_v40, %v1765_v51 }
 0x1b1   : > { %827 = vmatprep.mubr.bf16.mxu1 %v664_v49  ;;  %v642_v54 = vadd.f32 1.0, %v1435_v52  ;;  %v649_v56 = vmul.f32 0.5, %v641_v50 }
 0x1b2   : > { %828 = vmatmul.mubr.bf16.vlgmr.msra.gmra.mxu1 %v663_v53  ;;  %v656_v45 = vmul.f32 %v648_v55, %v1771_v58 }
 0x1b3   : > { %v650_v57 = vmul.f32 0.5, %v642_v54  ;;  %v657_v36 = vmul.f32 %v649_v56, %v1774_v62 }
 0x1b5   : > { %v658_v59 = vmul.f32 %v650_v57, %v585_v10  ;;  %v665_v61 = vpack.c.bf16 %v657_v36, %v655_v33 }
 0x1b7   : > { %v666_v60 = vpack.c.bf16 %v658_v59, %v656_v45 }
 0x1b9   : > { %835 = vmatprep.mubr.bf16.mxu1 %v666_v60 }
 0x1ba   : > { %836 = vmatmul.mubr.bf16.gmra.mxu1 %v665_v61 }
 0x272   : > { %v1253_v63 = vpop.f32.mrf.mxu1 }
 0x274   : > { %v1254_v2 = vpop.f32.mrf.mxu1 }
 0x275   : > { %v1255_v6 = vadd.f32 %v1254_v2, %v1253_v63 }
 0x276   : > { %v1256_v7 = vpop.f32.mrf.mxu1 }
 0x277   : > { %v866_v62 = vadd.f32 %v1255_v6, %v1201_v3 }
 0x278   : > { %v1257_v8 = vpop.f32.mrf.mxu1 }
 0x279   : > { %870 = vst [vmem:[%s1798_s16] sm:$0xff] %v866_v62  ;;  %v1258_v51 = vadd.f32 %v1257_v8, %v1256_v7 }
 0x27a   : > { %v1259_v58 = vpop.f32.mrf.mxu1 }
 0x27b   : > { %v867_v9 = vadd.f32 %v1258_v51, %v1201_v3 }
 0x27c   : > { %v1260_v10 = vpop.f32.mrf.mxu1 }
 0x27d   : > { %871 = vst [vmem:[%s1798_s16 + $0x8] sm:$0xff] %v867_v9  ;;  %v1261_v11 = vadd.f32 %v1260_v10, %v1259_v58 }
 0x27e   : > { %v1262_v0 = vpop.f32.mrf.mxu1 }
 0x27f   : > { %v868_v1 = vadd.f32 %v1261_v11, %v1201_v3 }
 0x280   : > { %v1263_v4 = vpop.f32.mrf.mxu1 }
 0x281   : > { %872 = vst [vmem:[%s1798_s16 + $0x10] sm:$0xff] %v868_v1  ;;  %v1264_v5 = vadd.f32 %v1263_v4, %v1262_v0  ;;  %880 = sbr.rel (!%p1603_p3) target bundleno = 685 (0x2ad), region = 52 }
 0x283   : > { %v869_v12 = vadd.f32 %v1264_v5, %v1201_v3 }
 0x285   : > { %873 = vst [vmem:[%s1798_s16 + $0x18] sm:$0xff] %v869_v12 }
 0x286   : > { %s1882_s18 = smov (!%p883_p9, %s882_s18), 4 }
 0x287   : > { %s1204_s30 = sshll.u32 %s1882_s18, 7 }
 0x288   : > { %p1207_p10 = scmp.eq.s32.totalorder %s1204_s30, 0 }
 0x289   : > { %s1817_s6 = sshrl.u32 (!%p1207_p10), %s1882_s18, 2 }
 0x28a   : > { %891 = sbr.rel (%p1207_p10) target bundleno = 685 (0x2ad), region = 56  ;;  %p1208_p11 = scmp.le.s32.totalorder (!%p1207_p10), %s1817_s6, 0 }
 0x28f   : > { %1073 = sbr.rel (%p1208_p11) target bundleno = 668 (0x29c), region = 141  ;;  %s1872_s20 = smov (!%p1208_p11), %s1811_s27 }
 0x290   : > { %s1873_s26 = smov (!%p1208_p11), %s1798_s16  ;;  %s1826_s29 = smov (!%p1208_p11), 0  }
 0x291   : > { %s1520_s7 = smov (!%p1208_p11), 0  }
 0x294 LB: >> { %v960_v13 = vld [vmem:[%s1514_s26] sm:$0xff]  ;;  %v962_v14 = vld [vmem:[%s1514_s26 + $0x8] sm:$0xff]  ;;  %v964_v15 = vld [vmem:[%s1514_s26 + $0x10] sm:$0xff]  ;;  %s968_s8 = sadd.s32 1, %s1518_s29  ;;  %s954_s7 = sadd.s32 1, %s1522_s7   ;;  %s1522_s7 = sphi %s1520_s7, %s954_s7   ;;  %s1518_s29 = sphi %s1826_s29, %s1874_s29   ;;  %s1514_s26 = sphi %s1873_s26, %s973_s26   ;;  %s1510_s20 = sphi %s1872_s20, %s974_s20  }
 0x295   : >> { %961 = vst [vmem:[%s1510_s20] sm:$0xff] %v960_v13  ;;  %963 = vst [vmem:[%s1510_s20 + $0x8] sm:$0xff] %v962_v14  ;;  %v966_v16 = vld [vmem:[%s1514_s26 + $0x18] sm:$0xff]  ;;  %p969_p12 = scmp.ge.s32.totalorder %s968_s8, %s1817_s6  ;;  %p953_p13 = scmp.ge.s32.totalorder %s954_s7, %s1817_s6 }
 0x296   : >> { %965 = vst [vmem:[%s1510_s20 + $0x10] sm:$0xff] %v964_v15  ;;  %967 = vst [vmem:[%s1510_s20 + $0x18] sm:$0xff] %v966_v16 }
 0x297   : >> { %s1884_s8 = smov (%p969_p12, %s968_s8), 0  ;;  %956 = sbr.rel (!%p953_p13) target bundleno = 660 (0x294), region = 147 }
 0x298   : >> { %s1209_s9 = sshll.u32 %s1884_s8, 5  ;;  %s1874_s29 = smov %s1884_s8 }
 0x299   : >> { %s973_s26 = scalar_lea.vmem %s1798_s16, %s1209_s9 [#allocation4]   ;;  %s974_s20 = scalar_lea.vmem %s1811_s27, %s1209_s9  }
 0x29c PF: > { %s1842_s10 = sand.u32 3, %s1882_s18   ;;  %s1224_s11 = sshll.u32 %s1817_s6, 5 }
 0x29d   : > { %s979_s12 = scalar_lea.vmem %s1798_s16, %s1224_s11 [#allocation4]   ;;  %s981_s13 = scalar_lea.vmem %s1811_s27, %s1224_s11  }
 0x29e   : > { %p1214_p0 = scmp.le.s32.totalorder %s1842_s10, 0 }
 0x29f   : > { %s1524_s14 = smov (!%p1214_p0), %s981_s13   ;;  %s1528_s15 = smov (!%p1214_p0), %s979_s12  }
 0x2a0   : > { %1087 = sbr.rel (%p1214_p0) target bundleno = 685 (0x2ad), region = 152  ;;  %s1532_s17 = smov (!%p1214_p0), 0  }
 0x2a1   : > { %s1536_s23 = smov (!%p1214_p0), 0  }
 0x2a5 LB: >> { %v991_v17 = vld [vmem:[%s1530_s15] sm:$0xff]  ;;  %s993_s18 = sadd.s32 1, %s1534_s17  ;;  %s985_s23 = sadd.s32 1, %s1538_s23   ;;  %s1538_s23 = sphi %s1536_s23, %s985_s23   ;;  %s1534_s17 = sphi %s1532_s17, %s1533_s17   ;;  %s1530_s15 = sphi %s1528_s15, %s998_s15   ;;  %s1526_s14 = sphi %s1524_s14, %s999_s14  }
 0x2a6   : >> { %992 = vst [vmem:[%s1526_s14] sm:$0xff] %v991_v17  ;;  %p994_p1 = scmp.ge.s32.totalorder %s993_s18, %s1842_s10  ;;  %p984_p2 = scmp.ge.s32.totalorder %s985_s23, %s1842_s10 }
 0x2a8   : >> { %s1886_s18 = smov (%p994_p1, %s993_s18), 0  ;;  %987 = sbr.rel (!%p984_p2) target bundleno = 677 (0x2a5), region = 158 }
 0x2a9   : >> { %s1215_s16 = sshll.u32 %s1886_s18, 3  ;;  %s1533_s17 = smov %s1886_s18  }
 0x2aa   : >> { %s998_s15 = scalar_lea.vmem %s979_s12, %s1215_s16 [#allocation4]   ;;  %s999_s14 = scalar_lea.vmem %s981_s13, %s1215_s16  }
 0x2ad PF: > { %s15_s22 = sadd.s32 1, %s1506_s22   ;;  %s1875_s18 = smov %s1494_s19 }
 0x2ae   : > { %p12_p3 = scmp.ge.s32.totalorder %s15_s22, 4   ;;  %s1876_s19 = smov %s1612_s28 }
 0x2af   : > { %s1877_s20 = smov %s1502_s21  ;;  %s1878_s21 = smov %s1880_s24 }
 0x2b0   :  { %14 = sbr.rel (!%p12_p3) target bundleno = 3 (0x3), region = 169 }

</bundles_post_ra>
